<compile_context>
chip_gen: v6e
topology: v6e:2x2x1
jax: 0.10.0
libtpu: 0.0.40
codegen_flags: <defaults>
</compile_context>

<pallas_src>
import functools

import jax
import jax.numpy as jnp
from jax.experimental import pallas as pl
from jax.experimental.pallas import tpu as pltpu


def _round_up(x, m):
    return ((x + m - 1) // m) * m


def _vmem_budget_bytes():
    """Generation-aware scoped-VMEM budget (leaves headroom under physical)."""
    cap = 64 * 1024 * 1024
    try:
        info = pltpu.get_tpu_info()
        cap = int(getattr(info, "vmem_capacity_bytes", cap))
    except Exception:
        pass
    if cap >= 128 * 1024 * 1024:          # v5e / v6e: 128 MiB physical VMEM
        return 100 * 1024 * 1024
    # v7x: 64 MiB per TensorCore (x is replicated per TC under megacore).
    return min(cap - 8 * 1024 * 1024, 56 * 1024 * 1024)


def _est_vmem_bytes(n_pad, k_pad, tile, x_item, w_item, out_item):
    x_bytes = n_pad * k_pad * x_item                 # resident x, single buffer
    wt_bytes = 2 * k_pad * tile * w_item             # double-buffered weight tile
    gb_bytes = 2 * 2 * tile * 4                      # double-buffered gamma/beta
    out_bytes = 2 * n_pad * tile * out_item          # double-buffered output tile
    tmp_bytes = 3 * n_pad * tile * 4                 # f32 y/d + epilogue temps
    return x_bytes + wt_bytes + gb_bytes + out_bytes + tmp_bytes


def _fc_bn_relu_kernel(x_ref, wt_ref, gb_ref, o_ref, *, eps, n_valid, with_bn):
    # x_ref: (N_pad, K_pad) resident in VMEM; wt_ref: (K_pad, tile_out);
    # gb_ref: (2, tile_out) = [gamma; beta] (BN) or [bias; 0] (no BN).
    y = jnp.dot(x_ref[...], wt_ref[...], preferred_element_type=jnp.float32)

    if not with_bn:
        bias = gb_ref[0:1, :].astype(jnp.float32)
        o_ref[...] = jnp.maximum(y + bias, 0.0).astype(o_ref.dtype)
        return

    n_pad = y.shape[0]
    inv_n = jnp.float32(1.0 / n_valid)

    # Padded batch rows of x are zero, so sum(y) only sees real rows; divide
    # by the true batch size.  Variance uses the numerically-safe two-pass
    # form; padded rows are masked out of the centered tensor.
    mean = jnp.sum(y, axis=0, keepdims=True) * inv_n
    d = y - mean
    if n_pad != n_valid:
        row = jax.lax.broadcasted_iota(jnp.int32, y.shape, 0)
        d = jnp.where(row < n_valid, d, 0.0)
    var = jnp.sum(d * d, axis=0, keepdims=True) * inv_n

    # Fused affine + ReLU on the centered tensor: out = relu(d*scale + beta).
    # rsqrt lowers to the EUP slot (essentially free next to the VALU work).
    scale = gb_ref[0:1, :].astype(jnp.float32) * jax.lax.rsqrt(var + eps)
    beta = gb_ref[1:2, :].astype(jnp.float32)
    o_ref[...] = jnp.maximum(d * scale + beta, 0.0).astype(o_ref.dtype)


def prepare_fc_params(w, b=None, gamma=None, beta=None, *, with_bn=True,
                      compute_dtype=None):
    """One-time parameter prep (hoisted out of the per-call hot path).

    w: (out_dim, inp_dim) PyTorch convention; b / gamma / beta: (out_dim,).
    """
    out_dim, inp_dim = w.shape
    k_pad = _round_up(inp_dim, 128)
    o_pad = _round_up(out_dim, 128)

    wt = jnp.transpose(w)                              # (inp_dim, out_dim)
    if compute_dtype is not None:
        wt = wt.astype(compute_dtype)
    wt_p = jnp.pad(wt, ((0, k_pad - inp_dim), (0, o_pad - out_dim)))

    if with_bn:
        g = (jnp.ones((out_dim,), jnp.float32) if gamma is None
             else gamma.astype(jnp.float32))
        be = (jnp.zeros((out_dim,), jnp.float32) if beta is None
              else beta.astype(jnp.float32))
        # Linear bias is exactly cancelled by BN's mean subtraction -> dropped.
        gb = jnp.stack([g, be], axis=0)                # (2, out_dim)
    else:
        bias = (jnp.zeros((out_dim,), jnp.float32) if b is None
                else b.astype(jnp.float32))
        gb = jnp.stack([bias, jnp.zeros_like(bias)], axis=0)
    gb_p = jnp.pad(gb, ((0, 0), (0, o_pad - out_dim)))

    return dict(wt_p=wt_p, gb_p=gb_p, inp_dim=inp_dim, out_dim=out_dim,
                k_pad=k_pad, o_pad=o_pad, with_bn=with_bn,
                compute_dtype=compute_dtype)


def fully_connected_forward(x, params, *, eps=1e-5):
    """Linear -> (optional) BatchNorm1d(training batch stats) -> ReLU."""
    n, inp_dim = x.shape
    assert inp_dim == params["inp_dim"]
    k_pad, o_pad = params["k_pad"], params["o_pad"]
    out_dim = params["out_dim"]
    wt_p, gb_p = params["wt_p"], params["gb_p"]
    with_bn = params["with_bn"]

    cdt = params["compute_dtype"]
    if cdt is not None and x.dtype != cdt:
        x = x.astype(cdt)

    # Pad batch to a sublane multiple (8 for 4-byte, 16 for 2-byte dtypes) and
    # inp_dim to 128 lanes; padded rows/cols are zero (harmless, masked/sliced).
    sub = 16 if x.dtype.itemsize == 2 else 8
    n_pad = _round_up(n, sub)
    x_p = jnp.pad(x, ((0, n_pad - n), (0, k_pad - inp_dim)))

    budget = _vmem_budget_bytes()
    x_item = x_p.dtype.itemsize
    w_item = wt_p.dtype.itemsize
    out_item = x_p.dtype.itemsize

    # Largest 128-multiple divisor of o_pad that fits the budget; prefer >=2
    # feature tiles so v7x's two TensorCores both get work (costs at most one
    # extra ~0.35us grid step on single-core parts).
    cands = [t for t in range(128, o_pad + 1, 128) if o_pad % t == 0]
    if o_pad >= 256:
        two = [t for t in cands if o_pad // t >= 2]
        if two:
            cands = two
    tile_out = 128
    for t in sorted(cands, reverse=True):
        if _est_vmem_bytes(n_pad, k_pad, t, x_item, w_item, out_item) <= int(0.8 * budget):
            tile_out = t
            break

    grid = (o_pad // tile_out,)
    kernel = functools.partial(_fc_bn_relu_kernel, eps=eps, n_valid=n,
                               with_bn=with_bn)

    out_p = pl.pallas_call(
        kernel,
        out_shape=jax.ShapeDtypeStruct((n_pad, o_pad), x_p.dtype),
        grid=grid,
        in_specs=[
            # Whole x resident in VMEM, single-buffered (constant across tiles).
            pl.BlockSpec(memory_space=pltpu.MemorySpace.VMEM),
            pl.BlockSpec((k_pad, tile_out), lambda j: (0, j)),   # weight tile
            pl.BlockSpec((2, tile_out), lambda j: (0, j)),       # [gamma;beta]
        ],
        out_specs=pl.BlockSpec((n_pad, tile_out), lambda j: (0, j)),
        compiler_params=pltpu.CompilerParams(
            dimension_semantics=("parallel",),
            vmem_limit_bytes=budget),
    )(x_p, wt_p, gb_p)
    return out_p[:n, :out_dim]


def _reference_bn(x, w, b, gamma, beta, eps=1e-5):
    y = x @ w.T + b
    mean = jnp.mean(y, axis=0, keepdims=True)
    var = jnp.mean((y - mean) ** 2, axis=0, keepdims=True)
    y = (y - mean) / jnp.sqrt(var + eps)
    y = gamma * y + beta
    return jnp.maximum(y, 0.0)


if __name__ == "__main__":
    # Small shapes consistent with the module: batch=8, inp_dim=32, out_dim=16.
    N, INP_DIM, OUT_DIM = 8, 32, 16

    key = jax.random.PRNGKey(0)
    kx, kw, kb, kg, kbe = jax.random.split(key, 5)

    x = jax.random.normal(kx, (N, INP_DIM), dtype=jnp.float32)

    # Linear init mimicking PyTorch defaults: U(-1/sqrt(fan_in), 1/sqrt(fan_in)).
    bound = 1.0 / jnp.sqrt(jnp.float32(INP_DIM))
    w = jax.random.uniform(kw, (OUT_DIM, INP_DIM), jnp.float32, -bound, bound)
    b = jax.random.uniform(kb, (OUT_DIM,), jnp.float32, -bound, bound)
    gamma = jax.random.uniform(kg, (OUT_DIM,), jnp.float32, 0.5, 1.5)
    beta = 0.1 * jax.random.normal(kbe, (OUT_DIM,), dtype=jnp.float32)

    # Default module config: with_bn=True.
    params_bn = prepare_fc_params(w, b, gamma, beta, with_bn=True)
    out_bn = jax.block_until_ready(fully_connected_forward(x, params_bn))
    ref_bn = _reference_bn(x, w, b, gamma, beta)
    assert out_bn.shape == (N, OUT_DIM)
    assert jnp.allclose(out_bn, ref_bn, atol=1e-4, rtol=1e-4), (
        f"BN path max err {jnp.max(jnp.abs(out_bn - ref_bn))}")

    # with_bn=False path (Linear + bias -> ReLU).
    params_nobn = prepare_fc_params(w, b, with_bn=False)
    out_nobn = jax.block_until_ready(fully_connected_forward(x, params_nobn))
    ref_nobn = jnp.maximum(x @ w.T + b, 0.0)
    assert jnp.allclose(out_nobn, ref_nobn, atol=1e-4, rtol=1e-4), (
        f"no-BN path max err {jnp.max(jnp.abs(out_nobn - ref_nobn))}")

    print("KERNEL_OK")
</pallas_src>

<mosaic_0001>
module attributes {stable_mosaic.version = 11 : i64} {
  func.func @_fc_bn_relu_kernel(%arg0: i32, %arg1: memref<8x128xf32, #tpu.memory_space<vmem>>, %arg2: memref<128x128xf32, #tpu.memory_space<vmem>>, %arg3: memref<2x128xf32, #tpu.memory_space<vmem>>, %arg4: memref<8x128xf32, #tpu.memory_space<vmem>>) attributes {dimension_semantics = [#tpu.dimension_semantics<parallel>], iteration_bounds = array<i64: 1>, scalar_prefetch = 0 : i64, scratch_operands = 0 : i64, tpu.core_type = #tpu.core_type<tc>, window_params = [{pipeline_mode = #tpu.pipeline_mode<synchronous>, transform_indices = @transform_0, window_bounds = array<i64: 8, 128>}, {transform_indices = @transform_1, window_bounds = array<i64: 128, 128>}, {transform_indices = @transform_2, window_bounds = array<i64: 2, 128>}, {transform_indices = @transform_3, window_bounds = array<i64: 8, 128>}]} {
    %c0 = arith.constant 0 : index
    %c0_0 = arith.constant 0 : index
    %0 = vector.load %arg1[%c0, %c0_0] : memref<8x128xf32, #tpu.memory_space<vmem>>, vector<8x128xf32>
    %c0_1 = arith.constant 0 : index
    %c0_2 = arith.constant 0 : index
    %1 = vector.load %arg2[%c0_1, %c0_2] : memref<128x128xf32, #tpu.memory_space<vmem>>, vector<128x128xf32>
    %cst = arith.constant dense<0.000000e+00> : vector<8x128xf32>
    %2 = tpu.matmul %0, %1, %cst {dimension_numbers = #tpu.dot_dimension_numbers<[1], [0], [0], [1], [0, 0, 1, 1], [], []>} : vector<8x128xf32>, vector<128x128xf32>, vector<8x128xf32> -> vector<8x128xf32>
    %cst_3 = arith.constant dense<0.000000e+00> : vector<128xf32>
    %3 = vector.multi_reduction <add>, %2, %cst_3 [0] : vector<8x128xf32> to vector<128xf32>
    %4 = vector.shape_cast %3 : vector<128xf32> to vector<1x128xf32>
    %cst_4 = arith.constant 1.250000e-01 : f32
    %5 = vector.broadcast %cst_4 : f32 to vector<1x128xf32>
    %6 = arith.mulf %4, %5 : vector<1x128xf32>
    %7 = vector.broadcast %6 : vector<1x128xf32> to vector<8x128xf32>
    %8 = arith.subf %2, %7 : vector<8x128xf32>
    %9 = arith.mulf %8, %8 : vector<8x128xf32>
    %cst_5 = arith.constant dense<0.000000e+00> : vector<128xf32>
    %10 = vector.multi_reduction <add>, %9, %cst_5 [0] : vector<8x128xf32> to vector<128xf32>
    %11 = vector.shape_cast %10 : vector<128xf32> to vector<1x128xf32>
    %cst_6 = arith.constant 1.250000e-01 : f32
    %12 = vector.broadcast %cst_6 : f32 to vector<1x128xf32>
    %13 = arith.mulf %11, %12 : vector<1x128xf32>
    %c0_7 = arith.constant 0 : index
    %c0_8 = arith.constant 0 : index
    %14 = vector.load %arg3[%c0_7, %c0_8] : memref<2x128xf32, #tpu.memory_space<vmem>>, vector<1x128xf32>
    %cst_9 = arith.constant 9.99999974E-6 : f32
    %15 = vector.broadcast %cst_9 : f32 to vector<1x128xf32>
    %16 = arith.addf %13, %15 : vector<1x128xf32>
    %17 = math.rsqrt %16 : vector<1x128xf32>
    %18 = arith.mulf %14, %17 : vector<1x128xf32>
    %c1 = arith.constant 1 : index
    %c0_10 = arith.constant 0 : index
    %19 = vector.load %arg3[%c1, %c0_10] : memref<2x128xf32, #tpu.memory_space<vmem>>, vector<1x128xf32>
    %20 = vector.broadcast %18 : vector<1x128xf32> to vector<8x128xf32>
    %21 = arith.mulf %8, %20 : vector<8x128xf32>
    %22 = vector.broadcast %19 : vector<1x128xf32> to vector<8x128xf32>
    %23 = arith.addf %21, %22 : vector<8x128xf32>
    %cst_11 = arith.constant 0.000000e+00 : f32
    %24 = vector.broadcast %cst_11 : f32 to vector<8x128xf32>
    %25 = arith.maximumf %23, %24 : vector<8x128xf32>
    %c0_12 = arith.constant 0 : index
    %c0_13 = arith.constant 0 : index
    %26 = vector.load %arg4[%c0_12, %c0_13] : memref<8x128xf32, #tpu.memory_space<vmem>>, vector<8x128xf32>
    tpu.vector_store %arg4[%c0_12, %c0_13], %25 {strides = array<i32>} : memref<8x128xf32, #tpu.memory_space<vmem>>, vector<8x128xf32>,
    return
  }
  func.func @transform_0(%arg0: i32) -> (i32, i32) {
    %c0_i32 = arith.constant 0 : i32
    %c0_i32_0 = arith.constant 0 : i32
    %c0_i32_1 = arith.constant 0 : i32
    return %c0_i32, %c0_i32_0 : i32, i32
  }
  func.func @transform_1(%arg0: i32) -> (i32, i32) {
    %c0_i32 = arith.constant 0 : i32
    %c0_i32_0 = arith.constant 0 : i32
    return %c0_i32, %arg0 : i32, i32
  }
  func.func @transform_2(%arg0: i32) -> (i32, i32) {
    %c0_i32 = arith.constant 0 : i32
    %c0_i32_0 = arith.constant 0 : i32
    return %c0_i32, %arg0 : i32, i32
  }
  func.func @transform_3(%arg0: i32) -> (i32, i32) {
    %c0_i32 = arith.constant 0 : i32
    %c0_i32_0 = arith.constant 0 : i32
    return %c0_i32, %arg0 : i32, i32
  }
}

</mosaic_0001>

<bundles_post_ra>
// kernel: tpu_custom_call.1
= control target key start
LH: loop header
LB: loop body
LE: loop exit
PB: predicated region body
PF: predicated region fallthrough
CT: control target
= control target key end

     0   :  { %8 = vsyncpa [#allocation3], 0  ;;  %s347_s0 = inlined_call_operand.hbm [shape: f32[8,128], index: 0, kind: input, shape index: {}]   ;;  %s348_s1 = inlined_call_operand.hbm [shape: f32[128,128], index: 1, kind: input, shape index: {}]   ;;  %s349_s2 = inlined_call_operand.vmem [shape: f32[2,128], index: 2, kind: input, shape index: {}]   ;;  %s350_s3 = inlined_call_operand.hbm [shape: f32[8,128], index: 3, kind: output, shape index: {}]  }
   0x1   :  { %9 = vsyncpa [#allocation6], 0 }
   0x2   :  { %10 = vsyncpa [#allocation4], 0  ;;  %s305_s12 = smov [#allocation2]   ;;  %s306_s14 = smov [#allocation5]  }
   0x3   :  { %s17_s13 = sshll.u32 %s305_s12, 4  ;;  %s26_s15 = sshll.u32 %s306_s14, 4  ;;  %s18_s13 = int_to_ptr.vmem [resolvable:$true] %s17_s13  ;;  %s27_s15 = int_to_ptr.vmem [resolvable:$true] %s26_s15 }
   0x4   :  { %s247_s16 = scalar_lea.vmem %s18_s13, 128  ;;  %p252_p1 = scmp.lt.s32.totalorder %s18_s13, %s18_s13 }
   0x5   :  { %p248_p0 = scmp.ne.s32.totalorder %s18_s13, %s247_s16  ;;  %p253_p2 = scmp.lt.s32.totalorder %s247_s16, %s247_s16 }
   0x7   :  { %p254_p3 = por %p253_p2, %p252_p1 }
   0x9   :  { %p255_p4 = pnand %p254_p3, %p248_p0 }
   0xb   :  { %258 = shalt.err (!%p255_p4)
}
   0xc   :  { %20 = dma.hbm_to_vmem [thread:$0]  %s347_s0, 128, %s18_s13, [#allocation3]  }
   0xd   :  { %s267_s19 = scalar_lea.vmem %s27_s15, 2048  ;;  %p272_p6 = scmp.lt.s32.totalorder %s27_s15, %s27_s15 }
   0xe   :  { %p268_p5 = scmp.ne.s32.totalorder %s27_s15, %s267_s19  ;;  %p273_p7 = scmp.lt.s32.totalorder %s267_s19, %s267_s19 }
  0x10   :  { %p274_p8 = por %p273_p7, %p272_p6 }
  0x12   :  { %p275_p9 = pnand %p274_p8, %p268_p5 }
  0x14   :  { %278 = shalt.err (!%p275_p9)
}
  0x15   :  { %s307_s20 = smov 128   ;;  %s308_s21 = smov 8  }
  0x16   :  { %32 = dma.hbm_to_vmem [thread:$0]  %s348_s1, 2048, %s27_s15, [#allocation6], %s307_s20, %s307_s20, %s308_s21  }
  0x17   :  { %299 = dma.done.wait [#allocation3], 128  }
  0x18   :  { %300 = vsyncadd [#allocation3], 4294967168 }
  0x19   :  { %301 = dma.done.wait [#allocation6], 2048  }
  0x1a   :  { %302 = vsyncadd [#allocation6], 4294965248  ;;  %v309_v0 = vmov 0.0   ;;  %vm310_vm0 = vmmov 0   ;;  %v57_v1 = vld [vmem:[#allocation5 + $0x78] sm:$0xff]  ;;  %v56_v2 = vld [vmem:[#allocation5 + $0x70] sm:$0xff]  ;;  %v149_v37 = vlaneseq }
  0x1b   :  { %195 = vmatprep.subr.mxu0 %v309_v0  ;;  %227 = vmatprep.mubr.msk.f32.mxu0 %vm310_vm0, %v309_v0  ;;  %v55_v3 = vld [vmem:[#allocation5 + $0x68] sm:$0xff]  ;;  %v54_v4 = vld [vmem:[#allocation5 + $0x60] sm:$0xff]  ;;  %v53_v5 = vld [vmem:[#allocation5 + $0x58] sm:$0xff]  ;;  %s311_s26 = smov [#allocation7]  }
  0x1c   :  { %196 = vmatpush3.msra.mxu0 %v57_v1  ;;  %v52_v6 = vld [vmem:[#allocation5 + $0x50] sm:$0xff]  ;;  %v51_v7 = vld [vmem:[#allocation5 + $0x48] sm:$0xff]  ;;  %v50_v8 = vld [vmem:[#allocation5 + $0x40] sm:$0xff]  ;;  %v150_v38 = vshrl.u32 %v149_v37, 7  ;;  %s167_s27 = sshll.u32 %s311_s26, 4  ;;  %s168_s27 = int_to_ptr.vmem [resolvable:$true] %s167_s27 }
  0x1d   :  { %197 = vmatprep.subr.mxu0 %v309_v0  ;;  %v49_v9 = vld [vmem:[#allocation5 + $0x38] sm:$0xff]  ;;  %v48_v10 = vld [vmem:[#allocation5 + $0x30] sm:$0xff]  ;;  %v47_v11 = vld [vmem:[#allocation5 + $0x28] sm:$0xff]  ;;  %s279_s28 = scalar_lea.vmem %s168_s27, 128  ;;  %p284_p11 = scmp.lt.s32.totalorder %s168_s27, %s168_s27 }
  0x1e   :  { %198 = vmatpush3.msra.mxu0 %v56_v2  ;;  %v46_v12 = vld [vmem:[#allocation5 + $0x20] sm:$0xff]  ;;  %v45_v13 = vld [vmem:[#allocation5 + $0x18] sm:$0xff]  ;;  %v44_v14 = vld [vmem:[#allocation5 + $0x10] sm:$0xff]  ;;  %v151_v40 = vsub.s32 0, %v150_v38  ;;  %p280_p10 = scmp.ne.s32.totalorder %s168_s27, %s279_s28  ;;  %p285_p12 = scmp.lt.s32.totalorder %s279_s28, %s279_s28 }
  0x1f   :  { %199 = vmatprep.subr.mxu0 %v309_v0  ;;  %v43_v15 = vld [vmem:[#allocation5 + $0x8] sm:$0xff]  ;;  %v42_v16 = vld [vmem:[#allocation5] sm:$0xff]  ;;  %v41_v17 = vld [vmem:[#allocation2] sm:$0xff] }
  0x20   :  { %200 = vmatpush3.msra.mxu0 %v55_v3  ;;  %v144_v39 = vld [vmem:[%s349_s2] sm:$0x1]  ;;  %v177_v44 = vld [vmem:[%s349_s2 + $0x1] ss:$0 sm:$0xff]  ;;  %p286_p13 = por %p285_p12, %p284_p11 }
  0x21   :  { %201 = vmatprep.subr.mxu0 %v309_v0 }
  0x22   :  { %202 = vmatpush3.msra.mxu0 %v54_v4  ;;  %p287_p0 = pnand %p286_p13, %p280_p10 }
  0x23   :  { %203 = vmatprep.subr.mxu0 %v309_v0 }
  0x24   :  { %204 = vmatpush3.msra.mxu0 %v53_v5 }
  0x25   :  { %205 = vmatprep.subr.mxu0 %v309_v0 }
  0x26   :  { %206 = vmatpush3.msra.mxu0 %v52_v6 }
  0x27   :  { %207 = vmatprep.subr.mxu0 %v309_v0 }
  0x28   :  { %208 = vmatpush3.msra.mxu0 %v51_v7 }
  0x29   :  { %209 = vmatprep.subr.mxu0 %v309_v0 }
  0x2a   :  { %210 = vmatpush3.msra.mxu0 %v50_v8 }
  0x2b   :  { %211 = vmatprep.subr.mxu0 %v309_v0 }
  0x2c   :  { %212 = vmatpush3.msra.mxu0 %v49_v9 }
  0x2d   :  { %213 = vmatprep.subr.mxu0 %v309_v0 }
  0x2e   :  { %214 = vmatpush3.msra.mxu0 %v48_v10 }
  0x2f   :  { %215 = vmatprep.subr.mxu0 %v309_v0 }
  0x30   :  { %216 = vmatpush3.msra.mxu0 %v47_v11 }
  0x31   :  { %217 = vmatprep.subr.mxu0 %v309_v0 }
  0x32   :  { %218 = vmatpush3.msra.mxu0 %v46_v12 }
  0x33   :  { %219 = vmatprep.subr.mxu0 %v309_v0 }
  0x34   :  { %220 = vmatpush3.msra.mxu0 %v45_v13 }
  0x35   :  { %221 = vmatprep.subr.mxu0 %v309_v0 }
  0x36   :  { %222 = vmatpush3.msra.mxu0 %v44_v14 }
  0x37   :  { %223 = vmatprep.subr.mxu0 %v309_v0 }
  0x38   :  { %224 = vmatpush3.msra.mxu0 %v43_v15 }
  0x39   :  { %225 = vmatprep.subr.mxu0 %v309_v0 }
  0x3a   :  { %226 = vmatpush3.msra.mxu0 %v42_v16 }
  0x3b   :  { %228 = vmatmul.mubr.f32.vlgmr.msra.gmra.mxu0 %v41_v17 }
  0xfb   :  { %v124_v18 = vpop.f32.mrf.mxu0 }
  0xfc   :  { %v128_v19 = vrot.slane %v124_v18, 4 }
  0xfd   :  { %v229_v20 = vpop.f32.mrf.mxu0 }
  0xfe   :  { %v129_v21 = vadd.f32 %v128_v19, %v124_v18 }
 0x100   :  { %v130_v22 = vrot.slane %v129_v21, 2 }
 0x102   :  { %v131_v23 = vadd.f32 %v130_v22, %v129_v21 }
 0x104   :  { %v132_v24 = vrot.slane %v131_v23, 1 }
 0x106   :  { %v133_v25 = vadd.f32 %v132_v24, %v131_v23 }
 0x108   :  { %v134_v26 = vmul.f32 0.125, %v133_v25 }
 0x10a   :  { %v135_v27 = vsub.f32 %v124_v18, %v134_v26 }
 0x10c   :  { %v136_v28 = vmul.f32 %v135_v27, %v135_v27 }
 0x10e   :  { %v137_v29 = vrot.slane %v136_v28, 4 }
 0x110   :  { %v138_v30 = vadd.f32 %v137_v29, %v136_v28 }
 0x112   :  { %v139_v31 = vrot.slane %v138_v30, 2 }
 0x114   :  { %v140_v32 = vadd.f32 %v139_v31, %v138_v30 }
 0x116   :  { %v141_v33 = vrot.slane %v140_v32, 1 }
 0x118   :  { %v142_v34 = vadd.f32 %v141_v33, %v140_v32 }
 0x11a   :  { %v143_v35 = vmul.f32 0.125, %v142_v34 }
 0x11c   :  { %v145_v36 = vadd.f32 1e-05, %v143_v35 }
 0x11e   :  { %237 = vrsqrt.f32 %v145_v36 }
 0x12b   :  { %v238_v41 = vpop.eup %237 }
 0x12c   :  { %v147_v42 = vmul.f32 %v238_v41, %v144_v39 }
 0x12e   :  { %v152_v43 = vrot.slane %v147_v42, %v151_v40 }
 0x130   :  { %v153_v45 = vmul.f32 %v152_v43, %v135_v27 }
 0x132   :  { %v158_v46 = vadd.f32 %v177_v44, %v153_v45 }
 0x134   :  { %v159_v47 = vmax.f32 %v158_v46, 0.0 }
 0x136   :  { %160 = vst [vmem:[#allocation7] sm:$0xff] %v159_v47 }
 0x137   :  { %290 = shalt.err (!%p287_p0)
}
 0x138   :  { %170 = dma.vmem_to_hbm [thread:$0]  %s168_s27, 128, %s350_s3, [#allocation4]  }
 0x139   :  { %303 = dma.done.wait [#allocation4], 128  }
 0x13a   :  { %304 = vsyncadd [#allocation4], 4294967168 }
 0x13b   :  { %174 = vsyncpa [#allocation3], 1 }
 0x13c   :  { %175 = vsyncpa [#allocation6], 1 }
 0x13d   :  { %176 = vsyncpa [#allocation4], 1 }

</bundles_post_ra>
